<compile_context>
chip_gen: v5e
topology: v5e:2x2
jax: 0.10.0
libtpu: 0.0.40
codegen_flags: <defaults>
</compile_context>

<pallas_src>
import functools

import jax
import jax.numpy as jnp
from jax import lax
from jax.experimental import pallas as pl
from jax.experimental.pallas import tpu as pltpu

HIDDEN = 32  # nn.LSTM hidden_size=32 (fixed by the module)


def _lstm3_fc_wavefront_kernel(x_ref,
                               wih0, whh0, b0,
                               wih1, whh1, b1,
                               wih2, whh2, b2,
                               fc_w, fc_b,
                               out_ref,
                               *, batch, steps, hidden):
    """Wavefront-pipelined 3-layer LSTM over `steps` timesteps + Linear head.

    x_ref:  (P*B, D)   time-major, flattened input (first P timesteps only)
    wihL:   (D_in, 4H) transposed weight_ih of layer L
    whhL:   (H, 4H)    transposed weight_hh of layer L
    bL:     (1, 4H)    b_ih + b_hh of layer L
    fc_w:   (H, C)     transposed fc weight
    fc_b:   (1, C)     fc bias
    out_ref:(P*B, C)   time-major, flattened output
    """
    B, P, H = batch, steps, hidden

    # Lane mask for the tanh ("g") gate region [2H, 3H); built once, reused.
    lanes = lax.broadcasted_iota(jnp.int32, (B, 4 * H), 1)
    g_mask = (lanes >= 2 * H) & (lanes < 3 * H)
    # scale = 1.0 on the g region (plain tanh), 0.5 elsewhere (tanh-form sigmoid).
    g_scale = jnp.where(g_mask, 1.0, 0.5).astype(jnp.float32)

    def cell(gates, c):
        # One EUP push: tanh over the whole (B, 4H) gates vreg.
        y = jnp.tanh(gates * g_scale)
        # sigmoid(x) = 0.5*tanh(x/2) + 0.5 on i/f/o;  tanh(x) on g.
        act = jnp.where(g_mask, y, 0.5 * y + 0.5)
        i_g = act[:, 0:H]
        f_g = act[:, H:2 * H]
        g_g = act[:, 2 * H:3 * H]
        o_g = act[:, 3 * H:4 * H]
        c_new = f_g * c + i_g * g_g
        h_new = o_g * jnp.tanh(c_new)           # second (and last) EUP push
        return h_new, c_new

    # Hoisted layer-0 input projection: ONE MXU matmul for all P timesteps.
    gx0 = jnp.dot(x_ref[...], wih0[...],
                  preferred_element_type=jnp.float32) + b0[...]          # (P*B, 4H)

    # Hoist weight / bias loads out of the unrolled recurrence.
    whh0_v = whh0[...]
    wih1_v, whh1_v, b1_v = wih1[...], whh1[...], b1[...]
    wih2_v, whh2_v, b2_v = wih2[...], whh2[...], b2[...]

    zeros = jnp.zeros((B, H), jnp.float32)
    h0, c0 = zeros, zeros
    h1, c1 = zeros, zeros
    h2, c2 = zeros, zeros
    h2_outs = []

    # Wavefront: step s runs layer0@t=s, layer1@t=s-1, layer2@t=s-2.
    # The three updates only read state from step s-1, so they are independent
    # within a step and their MXU/EUP latencies overlap.
    for s in range(P + 2):
        x1_in = h0   # layer-0 output at time s-1 (input to layer 1)
        x2_in = h1   # layer-1 output at time s-2 (input to layer 2)

        if s < P:                                   # layer 0 @ t = s
            g0 = gx0[s * B:(s + 1) * B, :] + jnp.dot(
                h0, whh0_v, preferred_element_type=jnp.float32)
            h0, c0 = cell(g0, c0)

        if 1 <= s < P + 1:                          # layer 1 @ t = s-1
            g1 = (jnp.dot(x1_in, wih1_v, preferred_element_type=jnp.float32)
                  + b1_v
                  + jnp.dot(h1, whh1_v, preferred_element_type=jnp.float32))
            h1, c1 = cell(g1, c1)

        if 2 <= s < P + 2:                          # layer 2 @ t = s-2
            g2 = (jnp.dot(x2_in, wih2_v, preferred_element_type=jnp.float32)
                  + b2_v
                  + jnp.dot(h2, whh2_v, preferred_element_type=jnp.float32))
            h2, c2 = cell(g2, c2)
            h2_outs.append(h2)

    # FC head: one (P*B, H) x (H, C) matmul over the collected layer-2 outputs.
    feats = jnp.concatenate(h2_outs, axis=0)                             # (P*B, H)
    out_ref[...] = jnp.dot(feats, fc_w[...],
                           preferred_element_type=jnp.float32) + fc_b[...]


def init_params(key, enc_in, c_out, hidden=HIDDEN, num_layers=3):
    """Deterministic PyTorch-style uniform init, weights stored pre-transposed."""
    params = {"layers": []}
    k = 1.0 / jnp.sqrt(hidden)
    keys = jax.random.split(key, num_layers * 4 + 2)
    ki = 0
    in_size = enc_in
    for _ in range(num_layers):
        w_ih = jax.random.uniform(keys[ki], (4 * hidden, in_size), jnp.float32, -k, k); ki += 1
        w_hh = jax.random.uniform(keys[ki], (4 * hidden, hidden), jnp.float32, -k, k); ki += 1
        b_ih = jax.random.uniform(keys[ki], (4 * hidden,), jnp.float32, -k, k); ki += 1
        b_hh = jax.random.uniform(keys[ki], (4 * hidden,), jnp.float32, -k, k); ki += 1
        params["layers"].append({
            "wih_t": w_ih.T,                       # (in, 4H)
            "whh_t": w_hh.T,                       # (H, 4H)
            "b": (b_ih + b_hh).reshape(1, 4 * hidden),
        })
        in_size = hidden
    kf = 1.0 / jnp.sqrt(hidden)
    fc_w = jax.random.uniform(keys[ki], (c_out, hidden), jnp.float32, -kf, kf); ki += 1
    fc_b = jax.random.uniform(keys[ki], (c_out,), jnp.float32, -kf, kf); ki += 1
    params["fc_w"] = fc_w.T                        # (H, C)
    params["fc_b"] = fc_b.reshape(1, c_out)
    return params


@functools.partial(jax.jit, static_argnames=("pred_len",))
def model_forward(x, params, pred_len):
    """x: (B, T, enc_in) batch_first, returns (B, pred_len, c_out)."""
    B, T, D = x.shape
    H = HIDDEN
    C = params["fc_w"].shape[1]

    # fc reads lstm_out[:, :pred_len, :] and the LSTM is causal, so only the
    # first P timesteps of x can influence the output.
    P = min(pred_len, T)

    # time-major, flattened to (P*B, D) so the layer-0 projection is one matmul.
    x_flat = jnp.transpose(x[:, :P, :], (1, 0, 2)).reshape(P * B, D)

    args = [x_flat]
    for lp in params["layers"]:
        args += [lp["wih_t"], lp["whh_t"], lp["b"]]
    args += [params["fc_w"], params["fc_b"]]

    kernel = functools.partial(_lstm3_fc_wavefront_kernel,
                               batch=B, steps=P, hidden=H)

    vmem = pl.BlockSpec(memory_space=pltpu.MemorySpace.VMEM)
    out_flat = pl.pallas_call(
        kernel,
        out_shape=jax.ShapeDtypeStruct((P * B, C), jnp.float32),
        in_specs=[vmem] * len(args),
        out_specs=vmem,
    )(*args)

    return jnp.transpose(out_flat.reshape(P, B, C), (1, 0, 2))


def reference_forward(x, params, pred_len):
    """Pure-JAX reference (full-length LSTM, then slice) for correctness checking."""
    H = HIDDEN

    def layer(xs, lp):
        def cell(carry, x_t):
            h, c = carry
            gates = x_t @ lp["wih_t"] + h @ lp["whh_t"] + lp["b"]
            i_g = jax.nn.sigmoid(gates[:, 0:H])
            f_g = jax.nn.sigmoid(gates[:, H:2 * H])
            g_g = jnp.tanh(gates[:, 2 * H:3 * H])
            o_g = jax.nn.sigmoid(gates[:, 3 * H:4 * H])
            c_new = f_g * c + i_g * g_g
            h_new = o_g * jnp.tanh(c_new)
            return (h_new, c_new), h_new

        B = xs.shape[1]
        init = (jnp.zeros((B, H)), jnp.zeros((B, H)))
        _, hs = lax.scan(cell, init, xs)
        return hs

    xs = jnp.transpose(x, (1, 0, 2))
    for lp in params["layers"]:
        xs = layer(xs, lp)
    feats = xs[:pred_len]                          # (P, B, H)
    y = feats @ params["fc_w"] + params["fc_b"]
    return jnp.transpose(y, (1, 0, 2))


if __name__ == "__main__":
    # small config consistent with the module: enc_in=4, c_out=4, seq=8, pred_len=4
    B, T, ENC_IN, C_OUT, PRED_LEN = 2, 8, 4, 4, 4

    key = jax.random.PRNGKey(0)
    k_param, k_x = jax.random.split(key)
    params = init_params(k_param, ENC_IN, C_OUT)
    x = jax.random.normal(k_x, (B, T, ENC_IN), jnp.float32)

    out = model_forward(x, params, PRED_LEN)
    jax.block_until_ready(out)

    ref = reference_forward(x, params, PRED_LEN)
    assert out.shape == (B, PRED_LEN, C_OUT), out.shape
    assert jnp.allclose(out, ref, atol=1e-4, rtol=1e-4), float(jnp.abs(out - ref).max())

    print("KERNEL_OK")
</pallas_src>

<mosaic_0001>
module attributes {stable_mosaic.version = 11 : i64} {
  func.func @_lstm3_fc_wavefront_kernel(%arg0: memref<8x4xf32, #tpu.memory_space<vmem>>, %arg1: memref<4x128xf32, #tpu.memory_space<vmem>>, %arg2: memref<32x128xf32, #tpu.memory_space<vmem>>, %arg3: memref<1x128xf32, #tpu.memory_space<vmem>>, %arg4: memref<32x128xf32, #tpu.memory_space<vmem>>, %arg5: memref<32x128xf32, #tpu.memory_space<vmem>>, %arg6: memref<1x128xf32, #tpu.memory_space<vmem>>, %arg7: memref<32x128xf32, #tpu.memory_space<vmem>>, %arg8: memref<32x128xf32, #tpu.memory_space<vmem>>, %arg9: memref<1x128xf32, #tpu.memory_space<vmem>>, %arg10: memref<32x4xf32, #tpu.memory_space<vmem>>, %arg11: memref<1x4xf32, #tpu.memory_space<vmem>>, %arg12: memref<8x4xf32, #tpu.memory_space<vmem>>) attributes {dimension_semantics = [], scalar_prefetch = 0 : i64, scratch_operands = 0 : i64, tpu.core_type = #tpu.core_type<tc>} {
    %0 = tpu.iota {dimensions = array<i32: 1>} : vector<2x128xi32>
    %c64_i32 = arith.constant 64 : i32
    %1 = vector.broadcast %c64_i32 : i32 to vector<2x128xi32>
    %2 = arith.cmpi sge, %0, %1 : vector<2x128xi32>
    %c96_i32 = arith.constant 96 : i32
    %3 = vector.broadcast %c96_i32 : i32 to vector<2x128xi32>
    %4 = arith.cmpi slt, %0, %3 : vector<2x128xi32>
    %5 = arith.andi %2, %4 : vector<2x128xi1>
    %cst = arith.constant 1.000000e+00 : f32
    %cst_0 = arith.constant 5.000000e-01 : f32
    %6 = vector.broadcast %cst : f32 to vector<2x128xf32>
    %7 = vector.broadcast %cst_0 : f32 to vector<2x128xf32>
    %8 = arith.select %5, %6, %7 : vector<2x128xi1>, vector<2x128xf32>
    %c0 = arith.constant 0 : index
    %c0_1 = arith.constant 0 : index
    %9 = vector.load %arg0[%c0, %c0_1] : memref<8x4xf32, #tpu.memory_space<vmem>>, vector<8x4xf32>
    %c0_2 = arith.constant 0 : index
    %c0_3 = arith.constant 0 : index
    %10 = vector.load %arg1[%c0_2, %c0_3] : memref<4x128xf32, #tpu.memory_space<vmem>>, vector<4x128xf32>
    %cst_4 = arith.constant dense<0.000000e+00> : vector<8x128xf32>
    %11 = tpu.matmul %9, %10, %cst_4 {dimension_numbers = #tpu.dot_dimension_numbers<[1], [0], [0], [1], [0, 0, 1, 1], [], []>} : vector<8x4xf32>, vector<4x128xf32>, vector<8x128xf32> -> vector<8x128xf32>
    %c0_5 = arith.constant 0 : index
    %c0_6 = arith.constant 0 : index
    %12 = vector.load %arg3[%c0_5, %c0_6] : memref<1x128xf32, #tpu.memory_space<vmem>>, vector<1x128xf32>
    %13 = vector.broadcast %12 : vector<1x128xf32> to vector<8x128xf32>
    %14 = arith.addf %11, %13 : vector<8x128xf32>
    %c0_7 = arith.constant 0 : index
    %c0_8 = arith.constant 0 : index
    %15 = vector.load %arg2[%c0_7, %c0_8] : memref<32x128xf32, #tpu.memory_space<vmem>>, vector<32x128xf32>
    %c0_9 = arith.constant 0 : index
    %c0_10 = arith.constant 0 : index
    %16 = vector.load %arg4[%c0_9, %c0_10] : memref<32x128xf32, #tpu.memory_space<vmem>>, vector<32x128xf32>
    %c0_11 = arith.constant 0 : index
    %c0_12 = arith.constant 0 : index
    %17 = vector.load %arg5[%c0_11, %c0_12] : memref<32x128xf32, #tpu.memory_space<vmem>>, vector<32x128xf32>
    %c0_13 = arith.constant 0 : index
    %c0_14 = arith.constant 0 : index
    %18 = vector.load %arg6[%c0_13, %c0_14] : memref<1x128xf32, #tpu.memory_space<vmem>>, vector<1x128xf32>
    %c0_15 = arith.constant 0 : index
    %c0_16 = arith.constant 0 : index
    %19 = vector.load %arg7[%c0_15, %c0_16] : memref<32x128xf32, #tpu.memory_space<vmem>>, vector<32x128xf32>
    %c0_17 = arith.constant 0 : index
    %c0_18 = arith.constant 0 : index
    %20 = vector.load %arg8[%c0_17, %c0_18] : memref<32x128xf32, #tpu.memory_space<vmem>>, vector<32x128xf32>
    %c0_19 = arith.constant 0 : index
    %c0_20 = arith.constant 0 : index
    %21 = vector.load %arg9[%c0_19, %c0_20] : memref<1x128xf32, #tpu.memory_space<vmem>>, vector<1x128xf32>
    %cst_21 = arith.constant 0.000000e+00 : f32
    %22 = vector.broadcast %cst_21 : f32 to vector<2x32xf32>
    %23 = vector.extract_strided_slice %14 {offsets = [0, 0], sizes = [2, 128], strides = [1, 1]} : vector<8x128xf32> to vector<2x128xf32>
    %cst_22 = arith.constant dense<0.000000e+00> : vector<2x128xf32>
    %24 = tpu.matmul %22, %15, %cst_22 {dimension_numbers = #tpu.dot_dimension_numbers<[1], [0], [0], [1], [0, 0, 1, 1], [], []>} : vector<2x32xf32>, vector<32x128xf32>, vector<2x128xf32> -> vector<2x128xf32>
    %25 = arith.addf %23, %24 : vector<2x128xf32>
    %26 = arith.mulf %25, %8 : vector<2x128xf32>
    %27 = math.tanh %26 : vector<2x128xf32>
    %cst_23 = arith.constant 5.000000e-01 : f32
    %28 = vector.broadcast %cst_23 : f32 to vector<2x128xf32>
    %29 = arith.mulf %28, %27 : vector<2x128xf32>
    %cst_24 = arith.constant 5.000000e-01 : f32
    %30 = vector.broadcast %cst_24 : f32 to vector<2x128xf32>
    %31 = arith.addf %29, %30 : vector<2x128xf32>
    %32 = arith.select %5, %27, %31 : vector<2x128xi1>, vector<2x128xf32>
    %33 = vector.extract_strided_slice %32 {offsets = [0, 0], sizes = [2, 32], strides = [1, 1]} : vector<2x128xf32> to vector<2x32xf32>
    %34 = vector.extract_strided_slice %32 {offsets = [0, 32], sizes = [2, 32], strides = [1, 1]} : vector<2x128xf32> to vector<2x32xf32>
    %35 = vector.extract_strided_slice %32 {offsets = [0, 64], sizes = [2, 32], strides = [1, 1]} : vector<2x128xf32> to vector<2x32xf32>
    %36 = vector.extract_strided_slice %32 {offsets = [0, 96], sizes = [2, 32], strides = [1, 1]} : vector<2x128xf32> to vector<2x32xf32>
    %37 = arith.mulf %34, %22 : vector<2x32xf32>
    %38 = arith.mulf %33, %35 : vector<2x32xf32>
    %39 = arith.addf %37, %38 : vector<2x32xf32>
    %40 = math.tanh %39 : vector<2x32xf32>
    %41 = arith.mulf %36, %40 : vector<2x32xf32>
    %42 = vector.extract_strided_slice %14 {offsets = [2, 0], sizes = [2, 128], strides = [1, 1]} : vector<8x128xf32> to vector<2x128xf32>
    %cst_25 = arith.constant dense<0.000000e+00> : vector<2x128xf32>
    %43 = tpu.matmul %41, %15, %cst_25 {dimension_numbers = #tpu.dot_dimension_numbers<[1], [0], [0], [1], [0, 0, 1, 1], [], []>} : vector<2x32xf32>, vector<32x128xf32>, vector<2x128xf32> -> vector<2x128xf32>
    %44 = arith.addf %42, %43 : vector<2x128xf32>
    %45 = arith.mulf %44, %8 : vector<2x128xf32>
    %46 = math.tanh %45 : vector<2x128xf32>
    %cst_26 = arith.constant 5.000000e-01 : f32
    %47 = vector.broadcast %cst_26 : f32 to vector<2x128xf32>
    %48 = arith.mulf %47, %46 : vector<2x128xf32>
    %cst_27 = arith.constant 5.000000e-01 : f32
    %49 = vector.broadcast %cst_27 : f32 to vector<2x128xf32>
    %50 = arith.addf %48, %49 : vector<2x128xf32>
    %51 = arith.select %5, %46, %50 : vector<2x128xi1>, vector<2x128xf32>
    %52 = vector.extract_strided_slice %51 {offsets = [0, 0], sizes = [2, 32], strides = [1, 1]} : vector<2x128xf32> to vector<2x32xf32>
    %53 = vector.extract_strided_slice %51 {offsets = [0, 32], sizes = [2, 32], strides = [1, 1]} : vector<2x128xf32> to vector<2x32xf32>
    %54 = vector.extract_strided_slice %51 {offsets = [0, 64], sizes = [2, 32], strides = [1, 1]} : vector<2x128xf32> to vector<2x32xf32>
    %55 = vector.extract_strided_slice %51 {offsets = [0, 96], sizes = [2, 32], strides = [1, 1]} : vector<2x128xf32> to vector<2x32xf32>
    %56 = arith.mulf %53, %39 : vector<2x32xf32>
    %57 = arith.mulf %52, %54 : vector<2x32xf32>
    %58 = arith.addf %56, %57 : vector<2x32xf32>
    %59 = math.tanh %58 : vector<2x32xf32>
    %60 = arith.mulf %55, %59 : vector<2x32xf32>
    %cst_28 = arith.constant dense<0.000000e+00> : vector<2x128xf32>
    %61 = tpu.matmul %41, %16, %cst_28 {dimension_numbers = #tpu.dot_dimension_numbers<[1], [0], [0], [1], [0, 0, 1, 1], [], []>} : vector<2x32xf32>, vector<32x128xf32>, vector<2x128xf32> -> vector<2x128xf32>
    %62 = vector.broadcast %18 : vector<1x128xf32> to vector<2x128xf32>
    %63 = arith.addf %61, %62 : vector<2x128xf32>
    %cst_29 = arith.constant dense<0.000000e+00> : vector<2x128xf32>
    %64 = tpu.matmul %22, %17, %cst_29 {dimension_numbers = #tpu.dot_dimension_numbers<[1], [0], [0], [1], [0, 0, 1, 1], [], []>} : vector<2x32xf32>, vector<32x128xf32>, vector<2x128xf32> -> vector<2x128xf32>
    %65 = arith.addf %63, %64 : vector<2x128xf32>
    %66 = arith.mulf %65, %8 : vector<2x128xf32>
    %67 = math.tanh %66 : vector<2x128xf32>
    %cst_30 = arith.constant 5.000000e-01 : f32
    %68 = vector.broadcast %cst_30 : f32 to vector<2x128xf32>
    %69 = arith.mulf %68, %67 : vector<2x128xf32>
    %cst_31 = arith.constant 5.000000e-01 : f32
    %70 = vector.broadcast %cst_31 : f32 to vector<2x128xf32>
    %71 = arith.addf %69, %70 : vector<2x128xf32>
    %72 = arith.select %5, %67, %71 : vector<2x128xi1>, vector<2x128xf32>
    %73 = vector.extract_strided_slice %72 {offsets = [0, 0], sizes = [2, 32], strides = [1, 1]} : vector<2x128xf32> to vector<2x32xf32>
    %74 = vector.extract_strided_slice %72 {offsets = [0, 32], sizes = [2, 32], strides = [1, 1]} : vector<2x128xf32> to vector<2x32xf32>
    %75 = vector.extract_strided_slice %72 {offsets = [0, 64], sizes = [2, 32], strides = [1, 1]} : vector<2x128xf32> to vector<2x32xf32>
    %76 = vector.extract_strided_slice %72 {offsets = [0, 96], sizes = [2, 32], strides = [1, 1]} : vector<2x128xf32> to vector<2x32xf32>
    %77 = arith.mulf %74, %22 : vector<2x32xf32>
    %78 = arith.mulf %73, %75 : vector<2x32xf32>
    %79 = arith.addf %77, %78 : vector<2x32xf32>
    %80 = math.tanh %79 : vector<2x32xf32>
    %81 = arith.mulf %76, %80 : vector<2x32xf32>
    %82 = vector.extract_strided_slice %14 {offsets = [4, 0], sizes = [2, 128], strides = [1, 1]} : vector<8x128xf32> to vector<2x128xf32>
    %cst_32 = arith.constant dense<0.000000e+00> : vector<2x128xf32>
    %83 = tpu.matmul %60, %15, %cst_32 {dimension_numbers = #tpu.dot_dimension_numbers<[1], [0], [0], [1], [0, 0, 1, 1], [], []>} : vector<2x32xf32>, vector<32x128xf32>, vector<2x128xf32> -> vector<2x128xf32>
    %84 = arith.addf %82, %83 : vector<2x128xf32>
    %85 = arith.mulf %84, %8 : vector<2x128xf32>
    %86 = math.tanh %85 : vector<2x128xf32>
    %cst_33 = arith.constant 5.000000e-01 : f32
    %87 = vector.broadcast %cst_33 : f32 to vector<2x128xf32>
    %88 = arith.mulf %87, %86 : vector<2x128xf32>
    %cst_34 = arith.constant 5.000000e-01 : f32
    %89 = vector.broadcast %cst_34 : f32 to vector<2x128xf32>
    %90 = arith.addf %88, %89 : vector<2x128xf32>
    %91 = arith.select %5, %86, %90 : vector<2x128xi1>, vector<2x128xf32>
    %92 = vector.extract_strided_slice %91 {offsets = [0, 0], sizes = [2, 32], strides = [1, 1]} : vector<2x128xf32> to vector<2x32xf32>
    %93 = vector.extract_strided_slice %91 {offsets = [0, 32], sizes = [2, 32], strides = [1, 1]} : vector<2x128xf32> to vector<2x32xf32>
    %94 = vector.extract_strided_slice %91 {offsets = [0, 64], sizes = [2, 32], strides = [1, 1]} : vector<2x128xf32> to vector<2x32xf32>
    %95 = vector.extract_strided_slice %91 {offsets = [0, 96], sizes = [2, 32], strides = [1, 1]} : vector<2x128xf32> to vector<2x32xf32>
    %96 = arith.mulf %93, %58 : vector<2x32xf32>
    %97 = arith.mulf %92, %94 : vector<2x32xf32>
    %98 = arith.addf %96, %97 : vector<2x32xf32>
    %99 = math.tanh %98 : vector<2x32xf32>
    %100 = arith.mulf %95, %99 : vector<2x32xf32>
    %cst_35 = arith.constant dense<0.000000e+00> : vector<2x128xf32>
    %101 = tpu.matmul %60, %16, %cst_35 {dimension_numbers = #tpu.dot_dimension_numbers<[1], [0], [0], [1], [0, 0, 1, 1], [], []>} : vector<2x32xf32>, vector<32x128xf32>, vector<2x128xf32> -> vector<2x128xf32>
    %102 = vector.broadcast %18 : vector<1x128xf32> to vector<2x128xf32>
    %103 = arith.addf %101, %102 : vector<2x128xf32>
    %cst_36 = arith.constant dense<0.000000e+00> : vector<2x128xf32>
    %104 = tpu.matmul %81, %17, %cst_36 {dimension_numbers = #tpu.dot_dimension_numbers<[1], [0], [0], [1], [0, 0, 1, 1], [], []>} : vector<2x32xf32>, vector<32x128xf32>, vector<2x128xf32> -> vector<2x128xf32>
    %105 = arith.addf %103, %104 : vector<2x128xf32>
    %106 = arith.mulf %105, %8 : vector<2x128xf32>
    %107 = math.tanh %106 : vector<2x128xf32>
    %cst_37 = arith.constant 5.000000e-01 : f32
    %108 = vector.broadcast %cst_37 : f32 to vector<2x128xf32>
    %109 = arith.mulf %108, %107 : vector<2x128xf32>
    %cst_38 = arith.constant 5.000000e-01 : f32
    %110 = vector.broadcast %cst_38 : f32 to vector<2x128xf32>
    %111 = arith.addf %109, %110 : vector<2x128xf32>
    %112 = arith.select %5, %107, %111 : vector<2x128xi1>, vector<2x128xf32>
    %113 = vector.extract_strided_slice %112 {offsets = [0, 0], sizes = [2, 32], strides = [1, 1]} : vector<2x128xf32> to vector<2x32xf32>
    %114 = vector.extract_strided_slice %112 {offsets = [0, 32], sizes = [2, 32], strides = [1, 1]} : vector<2x128xf32> to vector<2x32xf32>
    %115 = vector.extract_strided_slice %112 {offsets = [0, 64], sizes = [2, 32], strides = [1, 1]} : vector<2x128xf32> to vector<2x32xf32>
    %116 = vector.extract_strided_slice %112 {offsets = [0, 96], sizes = [2, 32], strides = [1, 1]} : vector<2x128xf32> to vector<2x32xf32>
    %117 = arith.mulf %114, %79 : vector<2x32xf32>
    %118 = arith.mulf %113, %115 : vector<2x32xf32>
    %119 = arith.addf %117, %118 : vector<2x32xf32>
    %120 = math.tanh %119 : vector<2x32xf32>
    %121 = arith.mulf %116, %120 : vector<2x32xf32>
    %cst_39 = arith.constant dense<0.000000e+00> : vector<2x128xf32>
    %122 = tpu.matmul %81, %19, %cst_39 {dimension_numbers = #tpu.dot_dimension_numbers<[1], [0], [0], [1], [0, 0, 1, 1], [], []>} : vector<2x32xf32>, vector<32x128xf32>, vector<2x128xf32> -> vector<2x128xf32>
    %123 = vector.broadcast %21 : vector<1x128xf32> to vector<2x128xf32>
    %124 = arith.addf %122, %123 : vector<2x128xf32>
    %cst_40 = arith.constant dense<0.000000e+00> : vector<2x128xf32>
    %125 = tpu.matmul %22, %20, %cst_40 {dimension_numbers = #tpu.dot_dimension_numbers<[1], [0], [0], [1], [0, 0, 1, 1], [], []>} : vector<2x32xf32>, vector<32x128xf32>, vector<2x128xf32> -> vector<2x128xf32>
    %126 = arith.addf %124, %125 : vector<2x128xf32>
    %127 = arith.mulf %126, %8 : vector<2x128xf32>
    %128 = math.tanh %127 : vector<2x128xf32>
    %cst_41 = arith.constant 5.000000e-01 : f32
    %129 = vector.broadcast %cst_41 : f32 to vector<2x128xf32>
    %130 = arith.mulf %129, %128 : vector<2x128xf32>
    %cst_42 = arith.constant 5.000000e-01 : f32
    %131 = vector.broadcast %cst_42 : f32 to vector<2x128xf32>
    %132 = arith.addf %130, %131 : vector<2x128xf32>
    %133 = arith.select %5, %128, %132 : vector<2x128xi1>, vector<2x128xf32>
    %134 = vector.extract_strided_slice %133 {offsets = [0, 0], sizes = [2, 32], strides = [1, 1]} : vector<2x128xf32> to vector<2x32xf32>
    %135 = vector.extract_strided_slice %133 {offsets = [0, 32], sizes = [2, 32], strides = [1, 1]} : vector<2x128xf32> to vector<2x32xf32>
    %136 = vector.extract_strided_slice %133 {offsets = [0, 64], sizes = [2, 32], strides = [1, 1]} : vector<2x128xf32> to vector<2x32xf32>
    %137 = vector.extract_strided_slice %133 {offsets = [0, 96], sizes = [2, 32], strides = [1, 1]} : vector<2x128xf32> to vector<2x32xf32>
    %138 = arith.mulf %135, %22 : vector<2x32xf32>
    %139 = arith.mulf %134, %136 : vector<2x32xf32>
    %140 = arith.addf %138, %139 : vector<2x32xf32>
    %141 = math.tanh %140 : vector<2x32xf32>
    %142 = arith.mulf %137, %141 : vector<2x32xf32>
    %143 = vector.extract_strided_slice %14 {offsets = [6, 0], sizes = [2, 128], strides = [1, 1]} : vector<8x128xf32> to vector<2x128xf32>
    %cst_43 = arith.constant dense<0.000000e+00> : vector<2x128xf32>
    %144 = tpu.matmul %100, %15, %cst_43 {dimension_numbers = #tpu.dot_dimension_numbers<[1], [0], [0], [1], [0, 0, 1, 1], [], []>} : vector<2x32xf32>, vector<32x128xf32>, vector<2x128xf32> -> vector<2x128xf32>
    %145 = arith.addf %143, %144 : vector<2x128xf32>
    %146 = arith.mulf %145, %8 : vector<2x128xf32>
    %147 = math.tanh %146 : vector<2x128xf32>
    %cst_44 = arith.constant 5.000000e-01 : f32
    %148 = vector.broadcast %cst_44 : f32 to vector<2x128xf32>
    %149 = arith.mulf %148, %147 : vector<2x128xf32>
    %cst_45 = arith.constant 5.000000e-01 : f32
    %150 = vector.broadcast %cst_45 : f32 to vector<2x128xf32>
    %151 = arith.addf %149, %150 : vector<2x128xf32>
    %152 = arith.select %5, %147, %151 : vector<2x128xi1>, vector<2x128xf32>
    %153 = vector.extract_strided_slice %152 {offsets = [0, 0], sizes = [2, 32], strides = [1, 1]} : vector<2x128xf32> to vector<2x32xf32>
    %154 = vector.extract_strided_slice %152 {offsets = [0, 32], sizes = [2, 32], strides = [1, 1]} : vector<2x128xf32> to vector<2x32xf32>
    %155 = vector.extract_strided_slice %152 {offsets = [0, 64], sizes = [2, 32], strides = [1, 1]} : vector<2x128xf32> to vector<2x32xf32>
    %156 = vector.extract_strided_slice %152 {offsets = [0, 96], sizes = [2, 32], strides = [1, 1]} : vector<2x128xf32> to vector<2x32xf32>
    %157 = arith.mulf %154, %98 : vector<2x32xf32>
    %158 = arith.mulf %153, %155 : vector<2x32xf32>
    %159 = arith.addf %157, %158 : vector<2x32xf32>
    %160 = math.tanh %159 : vector<2x32xf32>
    %161 = arith.mulf %156, %160 : vector<2x32xf32>
    %cst_46 = arith.constant dense<0.000000e+00> : vector<2x128xf32>
    %162 = tpu.matmul %100, %16, %cst_46 {dimension_numbers = #tpu.dot_dimension_numbers<[1], [0], [0], [1], [0, 0, 1, 1], [], []>} : vector<2x32xf32>, vector<32x128xf32>, vector<2x128xf32> -> vector<2x128xf32>
    %163 = vector.broadcast %18 : vector<1x128xf32> to vector<2x128xf32>
    %164 = arith.addf %162, %163 : vector<2x128xf32>
    %cst_47 = arith.constant dense<0.000000e+00> : vector<2x128xf32>
    %165 = tpu.matmul %121, %17, %cst_47 {dimension_numbers = #tpu.dot_dimension_numbers<[1], [0], [0], [1], [0, 0, 1, 1], [], []>} : vector<2x32xf32>, vector<32x128xf32>, vector<2x128xf32> -> vector<2x128xf32>
    %166 = arith.addf %164, %165 : vector<2x128xf32>
    %167 = arith.mulf %166, %8 : vector<2x128xf32>
    %168 = math.tanh %167 : vector<2x128xf32>
    %cst_48 = arith.constant 5.000000e-01 : f32
    %169 = vector.broadcast %cst_48 : f32 to vector<2x128xf32>
    %170 = arith.mulf %169, %168 : vector<2x128xf32>
    %cst_49 = arith.constant 5.000000e-01 : f32
    %171 = vector.broadcast %cst_49 : f32 to vector<2x128xf32>
    %172 = arith.addf %170, %171 : vector<2x128xf32>
    %173 = arith.select %5, %168, %172 : vector<2x128xi1>, vector<2x128xf32>
    %174 = vector.extract_strided_slice %173 {offsets = [0, 0], sizes = [2, 32], strides = [1, 1]} : vector<2x128xf32> to vector<2x32xf32>
    %175 = vector.extract_strided_slice %173 {offsets = [0, 32], sizes = [2, 32], strides = [1, 1]} : vector<2x128xf32> to vector<2x32xf32>
    %176 = vector.extract_strided_slice %173 {offsets = [0, 64], sizes = [2, 32], strides = [1, 1]} : vector<2x128xf32> to vector<2x32xf32>
    %177 = vector.extract_strided_slice %173 {offsets = [0, 96], sizes = [2, 32], strides = [1, 1]} : vector<2x128xf32> to vector<2x32xf32>
    %178 = arith.mulf %175, %119 : vector<2x32xf32>
    %179 = arith.mulf %174, %176 : vector<2x32xf32>
    %180 = arith.addf %178, %179 : vector<2x32xf32>
    %181 = math.tanh %180 : vector<2x32xf32>
    %182 = arith.mulf %177, %181 : vector<2x32xf32>
    %cst_50 = arith.constant dense<0.000000e+00> : vector<2x128xf32>
    %183 = tpu.matmul %121, %19, %cst_50 {dimension_numbers = #tpu.dot_dimension_numbers<[1], [0], [0], [1], [0, 0, 1, 1], [], []>} : vector<2x32xf32>, vector<32x128xf32>, vector<2x128xf32> -> vector<2x128xf32>
    %184 = vector.broadcast %21 : vector<1x128xf32> to vector<2x128xf32>
    %185 = arith.addf %183, %184 : vector<2x128xf32>
    %cst_51 = arith.constant dense<0.000000e+00> : vector<2x128xf32>
    %186 = tpu.matmul %142, %20, %cst_51 {dimension_numbers = #tpu.dot_dimension_numbers<[1], [0], [0], [1], [0, 0, 1, 1], [], []>} : vector<2x32xf32>, vector<32x128xf32>, vector<2x128xf32> -> vector<2x128xf32>
    %187 = arith.addf %185, %186 : vector<2x128xf32>
    %188 = arith.mulf %187, %8 : vector<2x128xf32>
    %189 = math.tanh %188 : vector<2x128xf32>
    %cst_52 = arith.constant 5.000000e-01 : f32
    %190 = vector.broadcast %cst_52 : f32 to vector<2x128xf32>
    %191 = arith.mulf %190, %189 : vector<2x128xf32>
    %cst_53 = arith.constant 5.000000e-01 : f32
    %192 = vector.broadcast %cst_53 : f32 to vector<2x128xf32>
    %193 = arith.addf %191, %192 : vector<2x128xf32>
    %194 = arith.select %5, %189, %193 : vector<2x128xi1>, vector<2x128xf32>
    %195 = vector.extract_strided_slice %194 {offsets = [0, 0], sizes = [2, 32], strides = [1, 1]} : vector<2x128xf32> to vector<2x32xf32>
    %196 = vector.extract_strided_slice %194 {offsets = [0, 32], sizes = [2, 32], strides = [1, 1]} : vector<2x128xf32> to vector<2x32xf32>
    %197 = vector.extract_strided_slice %194 {offsets = [0, 64], sizes = [2, 32], strides = [1, 1]} : vector<2x128xf32> to vector<2x32xf32>
    %198 = vector.extract_strided_slice %194 {offsets = [0, 96], sizes = [2, 32], strides = [1, 1]} : vector<2x128xf32> to vector<2x32xf32>
    %199 = arith.mulf %196, %140 : vector<2x32xf32>
    %200 = arith.mulf %195, %197 : vector<2x32xf32>
    %201 = arith.addf %199, %200 : vector<2x32xf32>
    %202 = math.tanh %201 : vector<2x32xf32>
    %203 = arith.mulf %198, %202 : vector<2x32xf32>
    %cst_54 = arith.constant dense<0.000000e+00> : vector<2x128xf32>
    %204 = tpu.matmul %161, %16, %cst_54 {dimension_numbers = #tpu.dot_dimension_numbers<[1], [0], [0], [1], [0, 0, 1, 1], [], []>} : vector<2x32xf32>, vector<32x128xf32>, vector<2x128xf32> -> vector<2x128xf32>
    %205 = vector.broadcast %18 : vector<1x128xf32> to vector<2x128xf32>
    %206 = arith.addf %204, %205 : vector<2x128xf32>
    %cst_55 = arith.constant dense<0.000000e+00> : vector<2x128xf32>
    %207 = tpu.matmul %182, %17, %cst_55 {dimension_numbers = #tpu.dot_dimension_numbers<[1], [0], [0], [1], [0, 0, 1, 1], [], []>} : vector<2x32xf32>, vector<32x128xf32>, vector<2x128xf32> -> vector<2x128xf32>
    %208 = arith.addf %206, %207 : vector<2x128xf32>
    %209 = arith.mulf %208, %8 : vector<2x128xf32>
    %210 = math.tanh %209 : vector<2x128xf32>
    %cst_56 = arith.constant 5.000000e-01 : f32
    %211 = vector.broadcast %cst_56 : f32 to vector<2x128xf32>
    %212 = arith.mulf %211, %210 : vector<2x128xf32>
    %cst_57 = arith.constant 5.000000e-01 : f32
    %213 = vector.broadcast %cst_57 : f32 to vector<2x128xf32>
    %214 = arith.addf %212, %213 : vector<2x128xf32>
    %215 = arith.select %5, %210, %214 : vector<2x128xi1>, vector<2x128xf32>
    %216 = vector.extract_strided_slice %215 {offsets = [0, 0], sizes = [2, 32], strides = [1, 1]} : vector<2x128xf32> to vector<2x32xf32>
    %217 = vector.extract_strided_slice %215 {offsets = [0, 32], sizes = [2, 32], strides = [1, 1]} : vector<2x128xf32> to vector<2x32xf32>
    %218 = vector.extract_strided_slice %215 {offsets = [0, 64], sizes = [2, 32], strides = [1, 1]} : vector<2x128xf32> to vector<2x32xf32>
    %219 = vector.extract_strided_slice %215 {offsets = [0, 96], sizes = [2, 32], strides = [1, 1]} : vector<2x128xf32> to vector<2x32xf32>
    %220 = arith.mulf %217, %180 : vector<2x32xf32>
    %221 = arith.mulf %216, %218 : vector<2x32xf32>
    %222 = arith.addf %220, %221 : vector<2x32xf32>
    %223 = math.tanh %222 : vector<2x32xf32>
    %224 = arith.mulf %219, %223 : vector<2x32xf32>
    %cst_58 = arith.constant dense<0.000000e+00> : vector<2x128xf32>
    %225 = tpu.matmul %182, %19, %cst_58 {dimension_numbers = #tpu.dot_dimension_numbers<[1], [0], [0], [1], [0, 0, 1, 1], [], []>} : vector<2x32xf32>, vector<32x128xf32>, vector<2x128xf32> -> vector<2x128xf32>
    %226 = vector.broadcast %21 : vector<1x128xf32> to vector<2x128xf32>
    %227 = arith.addf %225, %226 : vector<2x128xf32>
    %cst_59 = arith.constant dense<0.000000e+00> : vector<2x128xf32>
    %228 = tpu.matmul %203, %20, %cst_59 {dimension_numbers = #tpu.dot_dimension_numbers<[1], [0], [0], [1], [0, 0, 1, 1], [], []>} : vector<2x32xf32>, vector<32x128xf32>, vector<2x128xf32> -> vector<2x128xf32>
    %229 = arith.addf %227, %228 : vector<2x128xf32>
    %230 = arith.mulf %229, %8 : vector<2x128xf32>
    %231 = math.tanh %230 : vector<2x128xf32>
    %cst_60 = arith.constant 5.000000e-01 : f32
    %232 = vector.broadcast %cst_60 : f32 to vector<2x128xf32>
    %233 = arith.mulf %232, %231 : vector<2x128xf32>
    %cst_61 = arith.constant 5.000000e-01 : f32
    %234 = vector.broadcast %cst_61 : f32 to vector<2x128xf32>
    %235 = arith.addf %233, %234 : vector<2x128xf32>
    %236 = arith.select %5, %231, %235 : vector<2x128xi1>, vector<2x128xf32>
    %237 = vector.extract_strided_slice %236 {offsets = [0, 0], sizes = [2, 32], strides = [1, 1]} : vector<2x128xf32> to vector<2x32xf32>
    %238 = vector.extract_strided_slice %236 {offsets = [0, 32], sizes = [2, 32], strides = [1, 1]} : vector<2x128xf32> to vector<2x32xf32>
    %239 = vector.extract_strided_slice %236 {offsets = [0, 64], sizes = [2, 32], strides = [1, 1]} : vector<2x128xf32> to vector<2x32xf32>
    %240 = vector.extract_strided_slice %236 {offsets = [0, 96], sizes = [2, 32], strides = [1, 1]} : vector<2x128xf32> to vector<2x32xf32>
    %241 = arith.mulf %238, %201 : vector<2x32xf32>
    %242 = arith.mulf %237, %239 : vector<2x32xf32>
    %243 = arith.addf %241, %242 : vector<2x32xf32>
    %244 = math.tanh %243 : vector<2x32xf32>
    %245 = arith.mulf %240, %244 : vector<2x32xf32>
    %cst_62 = arith.constant dense<0.000000e+00> : vector<2x128xf32>
    %246 = tpu.matmul %224, %19, %cst_62 {dimension_numbers = #tpu.dot_dimension_numbers<[1], [0], [0], [1], [0, 0, 1, 1], [], []>} : vector<2x32xf32>, vector<32x128xf32>, vector<2x128xf32> -> vector<2x128xf32>
    %247 = vector.broadcast %21 : vector<1x128xf32> to vector<2x128xf32>
    %248 = arith.addf %246, %247 : vector<2x128xf32>
    %cst_63 = arith.constant dense<0.000000e+00> : vector<2x128xf32>
    %249 = tpu.matmul %245, %20, %cst_63 {dimension_numbers = #tpu.dot_dimension_numbers<[1], [0], [0], [1], [0, 0, 1, 1], [], []>} : vector<2x32xf32>, vector<32x128xf32>, vector<2x128xf32> -> vector<2x128xf32>
    %250 = arith.addf %248, %249 : vector<2x128xf32>
    %251 = arith.mulf %250, %8 : vector<2x128xf32>
    %252 = math.tanh %251 : vector<2x128xf32>
    %cst_64 = arith.constant 5.000000e-01 : f32
    %253 = vector.broadcast %cst_64 : f32 to vector<2x128xf32>
    %254 = arith.mulf %253, %252 : vector<2x128xf32>
    %cst_65 = arith.constant 5.000000e-01 : f32
    %255 = vector.broadcast %cst_65 : f32 to vector<2x128xf32>
    %256 = arith.addf %254, %255 : vector<2x128xf32>
    %257 = arith.select %5, %252, %256 : vector<2x128xi1>, vector<2x128xf32>
    %258 = vector.extract_strided_slice %257 {offsets = [0, 0], sizes = [2, 32], strides = [1, 1]} : vector<2x128xf32> to vector<2x32xf32>
    %259 = vector.extract_strided_slice %257 {offsets = [0, 32], sizes = [2, 32], strides = [1, 1]} : vector<2x128xf32> to vector<2x32xf32>
    %260 = vector.extract_strided_slice %257 {offsets = [0, 64], sizes = [2, 32], strides = [1, 1]} : vector<2x128xf32> to vector<2x32xf32>
    %261 = vector.extract_strided_slice %257 {offsets = [0, 96], sizes = [2, 32], strides = [1, 1]} : vector<2x128xf32> to vector<2x32xf32>
    %262 = arith.mulf %259, %243 : vector<2x32xf32>
    %263 = arith.mulf %258, %260 : vector<2x32xf32>
    %264 = arith.addf %262, %263 : vector<2x32xf32>
    %265 = math.tanh %264 : vector<2x32xf32>
    %266 = arith.mulf %261, %265 : vector<2x32xf32>
    %267 = tpu.concatenate %142, %203, %245, %266 in 0 : vector<2x32xf32>, vector<2x32xf32>, vector<2x32xf32>, vector<2x32xf32> -> vector<8x32xf32>
    %c0_66 = arith.constant 0 : index
    %c0_67 = arith.constant 0 : index
    %268 = vector.load %arg10[%c0_66, %c0_67] : memref<32x4xf32, #tpu.memory_space<vmem>>, vector<32x4xf32>
    %cst_68 = arith.constant dense<0.000000e+00> : vector<8x4xf32>
    %269 = tpu.matmul %267, %268, %cst_68 {dimension_numbers = #tpu.dot_dimension_numbers<[1], [0], [0], [1], [0, 0, 1, 1], [], []>} : vector<8x32xf32>, vector<32x4xf32>, vector<8x4xf32> -> vector<8x4xf32>
    %c0_69 = arith.constant 0 : index
    %c0_70 = arith.constant 0 : index
    %270 = vector.load %arg11[%c0_69, %c0_70] : memref<1x4xf32, #tpu.memory_space<vmem>>, vector<1x4xf32>
    %271 = vector.broadcast %270 : vector<1x4xf32> to vector<8x4xf32>
    %272 = arith.addf %269, %271 : vector<8x4xf32>
    %c0_71 = arith.constant 0 : index
    %c0_72 = arith.constant 0 : index
    %273 = vector.load %arg12[%c0_71, %c0_72] : memref<8x4xf32, #tpu.memory_space<vmem>>, vector<8x4xf32>
    tpu.vector_store %arg12[%c0_71, %c0_72], %272 {strides = array<i32>} : memref<8x4xf32, #tpu.memory_space<vmem>>, vector<8x4xf32>,
    return
  }
}

</mosaic_0001>

<bundles_post_ra>
// kernel: model_forward.1
= control target key start
LH: loop header
LB: loop body
LE: loop exit
PB: predicated region body
PF: predicated region fallthrough
CT: control target
= control target key end

     0   :  { %17 = vsyncpa [#allocation3], 0  ;;  %s1634_s0 = inlined_call_operand.vmem [shape: f32[8,4], index: 0, kind: input, shape index: {}]   ;;  %s1635_s1 = inlined_call_operand.vmem [shape: f32[4,128], index: 1, kind: input, shape index: {}]   ;;  %s1636_s2 = inlined_call_operand.vmem [shape: f32[32,128], index: 2, kind: input, shape index: {}]   ;;  %s1637_s3 = inlined_call_operand.hbm [shape: f32[1,128], index: 3, kind: input, shape index: {}]   ;;  %s1638_s4 = inlined_call_operand.vmem [shape: f32[32,128], index: 4, kind: input, shape index: {}]   ;;  %s1639_s5 = inlined_call_operand.hbm [shape: f32[32,128], index: 5, kind: input, shape index: {}]   ;;  %s1640_s6 = inlined_call_operand.vmem [shape: f32[1,128], index: 6, kind: input, shape index: {}]   ;;  %s1641_s7 = inlined_call_operand.hbm [shape: f32[32,128], index: 7, kind: input, shape index: {}]   ;;  %s1642_s8 = inlined_call_operand.hbm [shape: f32[32,128], index: 8, kind: input, shape index: {}]   ;;  %s1643_s9 = inlined_call_operand.vmem [shape: f32[1,128], index: 9, kind: input, shape index: {}]   ;;  %s1644_s10 = inlined_call_operand.vmem [shape: f32[32,4], index: 10, kind: input, shape index: {}]   ;;  %s1645_s11 = inlined_call_operand.hbm [shape: f32[1,4], index: 11, kind: input, shape index: {}]   ;;  %s1646_s12 = inlined_call_operand.vmem [shape: f32[8,4], index: 12, kind: output, shape index: {}]  }
   0x1   :  { %18 = vsyncpa [#allocation5], 0  ;;  %s43_s23 = sshll.u32 %s1639_s5, 4  ;;  %s44_s23 = int_to_ptr.hbm [resolvable:$true] %s43_s23 }
   0x2   :  { %19 = vsyncpa [#allocation8], 0  ;;  %s1201_s24 = smov [#allocation4]   ;;  %s71_s28 = sshll.u32 %s1642_s8, 4  ;;  %s72_s28 = int_to_ptr.hbm [resolvable:$true] %s71_s28 }
   0x3   :  { %s45_s25 = sshll.u32 %s1201_s24, 4  ;;  %s1202_s29 = smov 128   ;;  %s46_s25 = int_to_ptr.vmem [resolvable:$true] %s45_s25 }
   0x4   :  { %s1203_s30 = smov 8   ;;  %s1204_s13 = smov [#allocation7]  }
   0x5   :  { %51 = dma.hbm_to_vmem [thread:$0]  %s44_s23, 512, %s46_s25, [#allocation5], %s1202_s29, %s1202_s29, %s1203_s30  }
   0x6   :  { %s73_s14 = sshll.u32 %s1204_s13, 4  ;;  %s31_s17 = sshll.u32 %s1637_s3, 4  ;;  %s74_s14 = int_to_ptr.vmem [resolvable:$true] %s73_s14  ;;  %s32_s17 = int_to_ptr.hbm [resolvable:$true] %s31_s17 }
   0x7   :  { %79 = dma.hbm_to_vmem [thread:$0]  %s72_s28, 512, %s74_s14, [#allocation8], %s1202_s29, %s1202_s29, %s1203_s30  }
   0x8   :  { %s58_s19 = sshll.u32 %s1641_s7, 4  ;;  %s1205_s20 = smov [#allocation2]   ;;  %s59_s19 = int_to_ptr.hbm [resolvable:$true] %s58_s19 }
   0x9   :  { %s33_s21 = sshll.u32 %s1205_s20, 4  ;;  %s1206_s8 = smov [#allocation6]   ;;  %s34_s21 = int_to_ptr.vmem [resolvable:$true] %s33_s21 }
   0xa   :  { %36 = dma.hbm_to_vmem [thread:$0]  %s32_s17, 16, %s34_s21, [#allocation3]  }
   0xb   :  { %s60_s22 = sshll.u32 %s1206_s8, 4  ;;  %s89_s25 = sshll.u32 %s1645_s11, 4  ;;  %s61_s22 = int_to_ptr.vmem [resolvable:$true] %s60_s22  ;;  %s90_s25 = int_to_ptr.hbm [resolvable:$true] %s89_s25 }
   0xc   :  { %66 = dma.hbm_to_vmem [thread:$0]  %s59_s19, 512, %s61_s22, [#allocation5], %s1202_s29, %s1202_s29, %s1203_s30  }
   0xd   :  { %s1207_s3 = smov [#allocation9]  }
   0xe   :  { %s91_s26 = sshll.u32 %s1207_s3, 4  ;;  %s92_s26 = int_to_ptr.vmem [resolvable:$true] %s91_s26 }
   0xf   :  { %94 = dma.hbm_to_vmem [thread:$0]  %s90_s25, 16, %s92_s26, [#allocation8]  }
  0x10   :  { %1195 = dma.done.wait [#allocation3], 16  }
  0x11   :  { %1196 = vsyncadd [#allocation3], 4294967280 }
  0x12   :  { %1197 = dma.done.wait [#allocation5], 1024  }
  0x13   :  { %1198 = vsyncadd [#allocation5], 4294966272 }
  0x14   :  { %1199 = dma.done.wait [#allocation8], 528  }
  0x15   :  { %1200 = vsyncadd [#allocation8], 4294966768  ;;  %vm131_vm0 = vcmask 1043456   ;;  %vm127_vm1 = vcmask 31744   ;;  %v1295_v0 = vld [vmem:[%s1636_s2 + $0x18] sm:$0xff]  ;;  %v1300_v1 = vld [vmem:[%s1636_s2 + $0x10] sm:$0xff]  ;;  %v115_v7 = vlaneseq }
  0x16   :  { %v122_v2 = vld [vmem:[%s1635_s1] sm:$0xf]  ;;  %193 = vmatpush.msra.mxu1 %v1295_v0  ;;  %v1313_v4 = vld [vmem:[%s1636_s2 + $0x8] sm:$0xff]  ;;  %241 = vmatpush.msra.mxu2 %v1295_v0  ;;  %v1208_v6 = vmov 0.0   ;;  %v1209_v13 = vmov 0.5   ;;  %v1356_v28 = vld [vmem:[%s1638_s4 + $0x18] sm:$0xff] }
  0x17   :  { %992 = vmatpush.msk.msra.mxu0 %vm131_vm0, %v122_v2  ;;  %v121_v3 = vld [vmem:[%s1634_s0] sm:$0xff]  ;;  %v116_v8 = vand.u32 127, %v115_v7  ;;  %s1210_s0 = smov 64   ;;  %v1361_v29 = vld [vmem:[%s1638_s4 + $0x10] sm:$0xff]  ;;  %293 = vmatpush.msra.mxu3 %v1356_v28  ;;  %v1368_v30 = vld [vmem:[%s1638_s4 + $0x8] sm:$0xff]  ;;  %vm177_vm5 = vcmask 261120  }
  0x18   :  { %993 = vmatmul.msk.f32.vlgmr.msra.gmra.mxu0 %vm127_vm1, %v121_v3  ;;  %194 = vmatpush.msra.mxu1 %v1300_v1  ;;  %v1321_v5 = vld [vmem:[%s1636_s2] sm:$0xff]  ;;  %s1211_s2 = smov 32   ;;  %v1384_v35 = vld [vmem:[#allocation4 + $0x10] sm:$0xff]  ;;  %v1388_v36 = vld [vmem:[#allocation4 + $0x8] sm:$0xff]  ;;  %vm946_vm6 = vcmask 1041408   ;;  %vm949_vm7 = vcmask 1045504  }
  0x19   :  { %242 = vmatpush.msra.mxu2 %v1300_v1  ;;  %v1023_v9 = vld [vmem:[#allocation2] ss:$0 sm:$0xff]  ;;  %vm117_vm2 = vcmp.ge.s32.totalorder %v116_v8, 64  ;;  %vm118_vm3 = vcmp.lt.s32.totalorder %v116_v8, 96  ;;  %294 = vmatpush.msra.mxu3 %v1361_v29  ;;  %v1392_v37 = vld [vmem:[#allocation4] sm:$0xff]  ;;  %v953_v12 = vld [vmem:[%s1644_s10 + $0x10] sm:$0xff] }
  0x1a   :  { %195 = vmatpush.msra.mxu1 %v1313_v4  ;;  %vm1335_vm4 = vmand %vm117_vm2, %vm118_vm3  ;;  %v1375_v31 = vld [vmem:[%s1638_s4] sm:$0xff] }
  0x1b   :  { %243 = vmatpush.msra.mxu2 %v1313_v4  ;;  %v1341_v14 = vsel %vm1335_vm4, 1.0, %v1209_v13  ;;  %295 = vmatpush.msra.mxu3 %v1368_v30  ;;  %v1382_v34 = vld [vmem:[#allocation4 + $0x18] sm:$0xff] }
  0x1c   :  { %196 = vmatpush.msra.mxu1 %v1321_v5  ;;  %313 = vmatpush.msrb.mxu0 %v1382_v34  ;;  %v1412_v39 = vld [vmem:[%s1640_s6] ss:$0 sm:$0xff] }
  0x1d   :  { %197 = vmatmul.f32.vlgmr.msra.gmra.mxu1 %v1208_v6  ;;  %244 = vmatpush.msra.mxu2 %v1321_v5 }
  0x1e   :  { %362 = vmatpush.msrb.mxu1 %v1295_v0  ;;  %296 = vmatpush.msra.mxu3 %v1375_v31 }
  0x1f   :  { %411 = vmatpush.msrb.mxu2 %v1356_v28  ;;  %314 = vmatpush.msrb.mxu0 %v1384_v35 }
  0x20   :  { %363 = vmatpush.msrb.mxu1 %v1300_v1  ;;  %436 = vmatpush.msrb.mxu3 %v1382_v34 }
  0x21   :  { %412 = vmatpush.msrb.mxu2 %v1361_v29  ;;  %315 = vmatpush.msrb.mxu0 %v1388_v36 }
  0x22   :  { %364 = vmatpush.msrb.mxu1 %v1313_v4  ;;  %437 = vmatpush.msrb.mxu3 %v1384_v35 }
  0x23   :  { %413 = vmatpush.msrb.mxu2 %v1368_v30  ;;  %316 = vmatpush.msrb.mxu0 %v1392_v37 }
  0x24   :  { %365 = vmatpush.msrb.mxu1 %v1321_v5  ;;  %438 = vmatpush.msrb.mxu3 %v1388_v36 }
  0x25   :  { %414 = vmatpush.msrb.mxu2 %v1375_v31  ;;  %317 = vmatmul.f32.vlgmr.msrb.gmra.mxu0 %v1208_v6 }
  0x26   :  { %439 = vmatpush.msrb.mxu3 %v1392_v37 }
  0x95   :  { %v152_v10 = vpop.f32.mrf.mxu0 }
  0x96   :  { %v1333_v11 = vadd.f32 %v1023_v9, %v152_v10  ;;  %v1435_v10 = vld [vmem:[#allocation6 + $0x18] sm:$0xff] }
  0x97   :  { %482 = vmatpush.msra.mxu0 %v1435_v10 }
  0x9a   :  { %v198_v15 = vpop.f32.mrf.mxu1 }
  0x9b   :  { %v201_v16 = vadd.f32 %v198_v15, %v1333_v11 }
  0x9d   :  { %v202_v17 = vmul.f32 %v201_v16, %v1341_v14  ;;  %v1440_v16 = vld [vmem:[#allocation6 + $0x10] sm:$0xff] }
  0x9e   :  { %483 = vmatpush.msra.mxu0 %v1440_v16 }
  0x9f   :  { %1027 = vtanh.f32 %v202_v17  ;;  %v1442_v17 = vld [vmem:[#allocation7 + $0x18] sm:$0xff] }
  0xa0   :  { %502 = vmatpush.msra.mxu1 %v1442_v17 }
  0xa2   :  { %v318_v40 = vpop.f32.mrf.mxu0 }
  0xa5   :  { %v1028_v18 = vpop.eup %1027 }
  0xa6   :  { %v204_v19 = vmul.f32 0.5, %v1028_v18 }
  0xa8   :  { %v205_v20 = vadd.f32 0.5, %v204_v19  ;;  %v1448_v19 = vld [vmem:[#allocation7 + $0x10] sm:$0xff] }
  0xa9   :  { %503 = vmatpush.msra.mxu1 %v1448_v19 }
  0xaa   :  { %v206_v21 = vsel %vm1335_vm4, %v1028_v18, %v205_v20  ;;  %v1444_v18 = vld [vmem:[#allocation6 + $0x8] sm:$0xff]  ;;  %v1450_v20 = vld [vmem:[#allocation6] sm:$0xff] }
  0xab   :  { %209 = vrot.lane.b32.xlu0 %v206_v21, %s1210_s0  ;;  %v207_v24 = vmul.f32 0.0, %v206_v21  ;;  %484 = vmatpush.msra.mxu0 %v1444_v18 }
  0xad   :  { %485 = vmatpush.msra.mxu0 %v1450_v20 }
  0xaf   :  { %625 = vmatpush.msrb.mxu0 %v1382_v34 }
  0xb1   :  { %626 = vmatpush.msrb.mxu0 %v1384_v35 }
  0xb3   :  { %627 = vmatpush.msrb.mxu0 %v1388_v36 }
  0xb5   :  { %628 = vmatpush.msrb.mxu0 %v1392_v37 }
 0x11d   :  { %v210_v22 = vpop.permute.xlu0 %209 }
 0x11e   :  { %v212_v23 = vmul.f32 %v210_v22, %v206_v21  ;;  %v1458_v22 = vld [vmem:[#allocation7] sm:$0xff] }
 0x120   :  { %214 = vrot.lane.b32.xlu0 %v212_v23, %s1211_s2 }
 0x192   :  { %v215_v25 = vpop.permute.xlu0 %214 }
 0x193   :  { %v1349_v26 = vadd.f32 %v215_v25, %v207_v24 }
 0x195   :  { %1029 = vtanh.f32 %v1349_v26  ;;  %v259_v61 = vrot.slane %v1349_v26, 6 }
 0x19b   :  { %v1030_v27 = vpop.eup %1029 }
 0x19c   :  { %220 = vrot.lane.b32.xlu1 %v1030_v27, %s1210_s0  ;;  %v1494_v27 = vld [vmem:[%s1643_s9] ss:$0 sm:$0xff] }
 0x20e   :  { %v221_v32 = vpop.permute.xlu1 %220 }
 0x20f   :  { %v223_v33 = vmul.f32 %v221_v32, %v206_v21  ;;  %v1452_v21 = vld [vmem:[#allocation7 + $0x8] sm:$0xff] }
 0x210   :  { %504 = vmatpush.msra.mxu1 %v1452_v21 }
 0x211   :  { %225 = vrot.lane.b32.xlu1 %v223_v33, %s1211_s2 }
 0x212   :  { %505 = vmatpush.msra.mxu1 %v1458_v22 }
 0x283   :  { %v226_v38 = vpop.permute.xlu1 %225 }
 0x284   :  { %994 = vmatmul.msk.f32.vlgmr.msra.gmra.mxu2 %vm177_vm5, %v226_v38  ;;  %995 = vmatmul.msk.f32.vlgmr.msra.gmra.mxu3 %vm177_vm5, %v226_v38 }
 0x285   :  { %551 = vmatpush.msra.mxu2 %v1295_v0  ;;  %600 = vmatpush.msra.mxu3 %v1356_v28 }
 0x287   :  { %552 = vmatpush.msra.mxu2 %v1300_v1  ;;  %601 = vmatpush.msra.mxu3 %v1361_v29 }
 0x289   :  { %553 = vmatpush.msra.mxu2 %v1313_v4  ;;  %602 = vmatpush.msra.mxu3 %v1368_v30 }
 0x28b   :  { %554 = vmatpush.msra.mxu2 %v1321_v5  ;;  %603 = vmatpush.msra.mxu3 %v1375_v31 }
 0x307   :  { %v246_v41 = vpop.f32.mrf.mxu2  ;;  %v298_v42 = vpop.f32.mrf.mxu3 }
 0x308   :  { %v250_v43 = vrot.slane %v246_v41, 6  ;;  %v299_v44 = vadd.f32 %v1412_v39, %v298_v42 }
 0x30a   :  { %v252_v45 = vadd.f32 %v250_v43, %v1333_v11  ;;  %v321_v46 = vadd.f32 %v318_v40, %v299_v44 }
 0x30c   :  { %v253_v47 = vmul.f32 %v252_v45, %v1341_v14  ;;  %v322_v48 = vmul.f32 %v321_v46, %v1341_v14 }
 0x30e   :  { %1031 = vtanh.f32 %v253_v47 }
 0x30f   :  { %1033 = vtanh.f32 %v322_v48 }
 0x314   :  { %v1032_v49 = vpop.eup %1031 }
 0x315   :  { %v255_v50 = vmul.f32 0.5, %v1032_v49  ;;  %v1034_v51 = vpop.eup %1033 }
 0x316   :  { %v324_v54 = vmul.f32 0.5, %v1034_v51 }
 0x317   :  { %v256_v52 = vadd.f32 0.5, %v255_v50 }
 0x318   :  { %v325_v55 = vadd.f32 0.5, %v324_v54 }
 0x319   :  { %v257_v53 = vsel %vm1335_vm4, %v1032_v49, %v256_v52 }
 0x31a   :  { %263 = vrot.lane.b32.xlu2 %v257_v53, %s1210_s0  ;;  %v326_v56 = vsel %vm1335_vm4, %v1034_v51, %v325_v55  ;;  %v261_v62 = vmul.f32 %v259_v61, %v257_v53 }
 0x31b   :  { %v327_v1 = vmul.f32 0.0, %v326_v56 }
 0x322   :  { %329 = vrot.lane.b32.xlu2 %v326_v56, %s1210_s0 }
 0x374   :  { %v264_v57 = vpop.permute.xlu2 %263 }
 0x375   :  { %v266_v58 = vmul.f32 %v264_v57, %v257_v53 }
 0x377   :  { %268 = vrot.lane.b32.xlu0 %v266_v58, %s1211_s2 }
 0x37c   :  { %v330_v59 = vpop.permute.xlu2 %329 }
 0x37d   :  { %v332_v60 = vmul.f32 %v330_v59, %v326_v56 }
 0x37f   :  { %334 = vrot.lane.b32.xlu1 %v332_v60, %s1211_s2 }
 0x3e9   :  { %v269_v63 = vpop.permute.xlu0 %268 }
 0x3ea   :  { %v1427_v0 = vadd.f32 %v269_v63, %v261_v62 }
 0x3ec   :  { %1035 = vtanh.f32 %v1427_v0  ;;  %v380_v62 = vrot.slane %v1427_v0, 6 }
 0x3f1   :  { %v335_v2 = vpop.permute.xlu1 %334 }
 0x3f2   :  { %v1036_v3 = vpop.eup %1035  ;;  %v1430_v4 = vadd.f32 %v335_v2, %v327_v1 }
 0x3f3   :  { %274 = vrot.lane.b32.xlu2 %v1036_v3, %s1210_s0 }
 0x3f4   :  { %1037 = vtanh.f32 %v1430_v4 }
 0x3fa   :  { %v1038_v5 = vpop.eup %1037 }
 0x3fb   :  { %340 = vrot.lane.b32.xlu0 %v1038_v5, %s1210_s0 }
 0x44d   :  { %v275_v7 = vpop.permute.xlu2 %274 }
 0x44e   :  { %v277_v8 = vmul.f32 %v275_v7, %v257_v53 }
 0x450   :  { %v345_v9 = vrot.slane %v277_v8, 2 }
 0x452   :  { %346 = vrot.lane.b32.xlu1 %v345_v9, %s1211_s2 }
 0x46d   :  { %v341_v13 = vpop.permute.xlu0 %340 }
 0x46e   :  { %v343_v15 = vmul.f32 %v341_v13, %v326_v56 }
 0x470   :  { %420 = vrot.lane.b32.xlu2 %v343_v15, %s1211_s2 }
 0x4c4   :  { %v347_v23 = vpop.permute.xlu1 %346 }
 0x4c5   :  { %996 = vmatmul.msk.f32.vlgmr.msrb.gmra.mxu1 %vm177_vm5, %v347_v23  ;;  %997 = vmatmul.msk.f32.vlgmr.msrb.gmra.mxu2 %vm177_vm5, %v347_v23 }
 0x4c6   :  { %668 = vmatpush.msrb.mxu1 %v1435_v10  ;;  %693 = vmatpush.msrb.mxu2 %v1442_v17 }
 0x4c8   :  { %669 = vmatpush.msrb.mxu1 %v1440_v16  ;;  %694 = vmatpush.msrb.mxu2 %v1448_v19 }
 0x4ca   :  { %v421_v24 = vpop.permute.xlu2 %420  ;;  %670 = vmatpush.msrb.mxu1 %v1444_v18  ;;  %695 = vmatpush.msrb.mxu2 %v1452_v21 }
 0x4cb   :  { %998 = vmatmul.msk.f32.vlgmr.msrb.gmra.mxu3 %vm177_vm5, %v421_v24  ;;  %999 = vmatmul.msk.f32.vlgmr.msra.gmra.mxu0 %vm177_vm5, %v421_v24 }
 0x4cc   :  { %671 = vmatpush.msrb.mxu1 %v1450_v20  ;;  %696 = vmatpush.msrb.mxu2 %v1458_v22 }
 0x4cd   :  { %506 = vmatmul.f32.vlgmr.msra.gmra.mxu1 %v1208_v6  ;;  %767 = vmatpush.msra.mxu0 %v1382_v34 }
 0x4ce   :  { %810 = vmatpush.msra.mxu1 %v1435_v10  ;;  %742 = vmatpush.msrb.mxu3 %v1356_v28 }
 0x4cf   :  { %768 = vmatpush.msra.mxu0 %v1384_v35 }
 0x4d0   :  { %811 = vmatpush.msra.mxu1 %v1440_v16  ;;  %743 = vmatpush.msrb.mxu3 %v1361_v29 }
 0x4d1   :  { %769 = vmatpush.msra.mxu0 %v1388_v36 }
 0x4d2   :  { %812 = vmatpush.msra.mxu1 %v1444_v18  ;;  %744 = vmatpush.msrb.mxu3 %v1368_v30 }
 0x4d3   :  { %770 = vmatpush.msra.mxu0 %v1392_v37 }
 0x4d4   :  { %813 = vmatpush.msra.mxu1 %v1450_v20  ;;  %745 = vmatpush.msrb.mxu3 %v1375_v31 }
 0x542   :  { %v367_v6 = vpop.f32.mrf.mxu1 }
 0x543   :  { %v371_v25 = vrot.slane %v367_v6, 4 }
 0x545   :  { %v373_v26 = vadd.f32 %v371_v25, %v1333_v11 }
 0x547   :  { %v374_v28 = vmul.f32 %v373_v26, %v1341_v14 }
 0x548   :  { %v487_v29 = vpop.f32.mrf.mxu0  ;;  %v416_v32 = vpop.f32.mrf.mxu2 }
 0x549   :  { %1039 = vtanh.f32 %v374_v28  ;;  %v488_v30 = vadd.f32 %v1494_v27, %v487_v29  ;;  %v417_v31 = vadd.f32 %v1412_v39, %v416_v32 }
 0x54a   :  { %v507_v33 = vpop.f32.mrf.mxu1 }
 0x54b   :  { %v510_v34 = vadd.f32 %v507_v33, %v488_v30 }
 0x54d   :  { %v511_v35 = vmul.f32 %v510_v34, %v1341_v14 }
 0x54e   :  { %v441_v36 = vpop.f32.mrf.mxu3 }
 0x54f   :  { %v1040_v37 = vpop.eup %1039  ;;  %1041 = vtanh.f32 %v511_v35  ;;  %v444_v38 = vadd.f32 %v441_v36, %v417_v31 }
 0x550   :  { %v376_v40 = vmul.f32 0.5, %v1040_v37 }
 0x551   :  { %v445_v41 = vmul.f32 %v444_v38, %v1341_v14 }
 0x552   :  { %v377_v42 = vadd.f32 0.5, %v376_v40 }
 0x553   :  { %1043 = vtanh.f32 %v445_v41 }
 0x554   :  { %v378_v43 = vsel %vm1335_vm4, %v1040_v37, %v377_v42 }
 0x555   :  { %v1042_v44 = vpop.eup %1041  ;;  %384 = vrot.lane.b32.xlu0 %v378_v43, %s1210_s0  ;;  %v382_v63 = vmul.f32 %v380_v62, %v378_v43 }
 0x556   :  { %v513_v45 = vmul.f32 0.5, %v1042_v44 }
 0x558   :  { %v514_v46 = vadd.f32 0.5, %v513_v45 }
 0x559   :  { %v1044_v47 = vpop.eup %1043 }
 0x55a   :  { %v515_v48 = vsel %vm1335_vm4, %v1042_v44, %v514_v46  ;;  %v447_v49 = vmul.f32 0.5, %v1044_v47 }
 0x55b   :  { %518 = vrot.lane.b32.xlu1 %v515_v48, %s1210_s0  ;;  %v516_v3 = vmul.f32 0.0, %v515_v48 }
 0x55c   :  { %v448_v50 = vadd.f32 0.5, %v447_v49 }
 0x55e   :  { %v449_v51 = vsel %vm1335_vm4, %v1044_v47, %v448_v50 }
 0x55f   :  { %452 = vrot.lane.b32.xlu2 %v449_v51, %s1210_s0  ;;  %v450_v58 = vmul.f32 %v449_v51, %v1430_v4 }
 0x5b9   :  { %v453_v52 = vpop.permute.xlu2 %452 }
 0x5ba   :  { %v455_v53 = vmul.f32 %v453_v52, %v449_v51 }
 0x5bc   :  { %457 = vrot.lane.b32.xlu2 %v455_v53, %s1211_s2 }
 0x5c7   :  { %v385_v54 = vpop.permute.xlu0 %384 }
 0x5c8   :  { %v387_v55 = vmul.f32 %v385_v54, %v378_v43 }
 0x5ca   :  { %389 = vrot.lane.b32.xlu0 %v387_v55, %s1211_s2 }
 0x5cd   :  { %v519_v56 = vpop.permute.xlu1 %518 }
 0x5ce   :  { %v521_v57 = vmul.f32 %v519_v56, %v515_v48 }
 0x5d0   :  { %523 = vrot.lane.b32.xlu1 %v521_v57, %s1211_s2 }
 0x616   :  { %v458_v59 = vpop.permute.xlu2 %457 }
 0x617   :  { %v1514_v60 = vadd.f32 %v458_v59, %v450_v58 }
 0x619   :  { %1045 = vtanh.f32 %v1514_v60 }
 0x61f   :  { %v1046_v61 = vpop.eup %1045 }
 0x620   :  { %463 = vrot.lane.b32.xlu2 %v1046_v61, %s1210_s0 }
 0x63c   :  { %v390_v1 = vpop.permute.xlu0 %389 }
 0x63d   :  { %v1519_v2 = vadd.f32 %v390_v1, %v382_v63 }
 0x63f   :  { %1047 = vtanh.f32 %v1519_v2  ;;  %v569_v57 = vrot.slane %v1519_v2, 6 }
 0x642   :  { %v524_v5 = vpop.permute.xlu1 %523 }
 0x643   :  { %v1522_v7 = vadd.f32 %v524_v5, %v516_v3 }
 0x645   :  { %v1048_v4 = vpop.eup %1047  ;;  %1049 = vtanh.f32 %v1522_v7 }
 0x646   :  { %395 = vrot.lane.b32.xlu0 %v1048_v4, %s1210_s0 }
 0x64b   :  { %v1050_v8 = vpop.eup %1049 }
 0x64c   :  { %529 = vrot.lane.b32.xlu1 %v1050_v8, %s1210_s0 }
 0x67a   :  { %v464_v9 = vpop.permute.xlu2 %463 }
 0x67b   :  { %v466_v0 = vmul.f32 %v464_v9, %v449_v51 }
 0x67d   :  { %609 = vrot.lane.b32.xlu2 %v466_v0, %s1211_s2 }
 0x6b8   :  { %v396_v13 = vpop.permute.xlu0 %395 }
 0x6b9   :  { %v398_v15 = vmul.f32 %v396_v13, %v378_v43 }
 0x6bb   :  { %v534_v23 = vrot.slane %v398_v15, 4 }
 0x6bd   :  { %535 = vrot.lane.b32.xlu0 %v534_v23, %s1211_s2 }
 0x6be   :  { %v530_v24 = vpop.permute.xlu1 %529 }
 0x6bf   :  { %v1529_v6 = vmul.f32 %v530_v24, %v515_v48 }
 0x6c1   :  { %677 = vrot.lane.b32.xlu1 %v1529_v6, %s1211_s2 }
 0x6d7   :  { %v610_v25 = vpop.permute.xlu2 %609 }
 0x6d8   :  { %1002 = vmatmul.msk.f32.vlgmr.msrb.gmra.mxu0 %vm177_vm5, %v610_v25  ;;  %1003 = vmatmul.msk.f32.vlgmr.msrb.gmra.mxu1 %vm177_vm5, %v610_v25 }
 0x6d9   :  { %908 = vmatpush.msrb.mxu0 %v1442_v17 }
 0x6db   :  { %909 = vmatpush.msrb.mxu0 %v1448_v19 }
 0x6dd   :  { %910 = vmatpush.msrb.mxu0 %v1452_v21 }
 0x6df   :  { %911 = vmatpush.msrb.mxu0 %v1458_v22 }
 0x72f   :  { %v536_v26 = vpop.permute.xlu0 %535 }
 0x730   :  { %1000 = vmatmul.msk.f32.vlgmr.msra.gmra.mxu2 %vm177_vm5, %v536_v26  ;;  %1001 = vmatmul.msk.f32.vlgmr.msra.gmra.mxu3 %vm177_vm5, %v536_v26 }
 0x731   :  { %835 = vmatpush.msra.mxu2 %v1442_v17  ;;  %883 = vmatpush.msra.mxu3 %v1435_v10 }
 0x733   :  { %836 = vmatpush.msra.mxu2 %v1448_v19  ;;  %884 = vmatpush.msra.mxu3 %v1440_v16  ;;  %v678_v28 = vpop.permute.xlu1 %677 }
 0x735   :  { %837 = vmatpush.msra.mxu2 %v1452_v21  ;;  %885 = vmatpush.msra.mxu3 %v1444_v18 }
 0x737   :  { %838 = vmatpush.msra.mxu2 %v1458_v22  ;;  %886 = vmatpush.msra.mxu3 %v1450_v20 }
 0x738   :  { %1004 = vmatmul.msk.f32.vlgmr.msrb.gmra.mxu2 %vm177_vm5, %v678_v28 }
 0x755   :  { %v630_v32 = vpop.f32.mrf.mxu0  ;;  %v673_v33 = vpop.f32.mrf.mxu1 }
 0x756   :  { %v674_v22 = vadd.f32 %v1494_v27, %v673_v33 }
 0x7b3   :  { %v556_v29 = vpop.f32.mrf.mxu2  ;;  %v605_v30 = vpop.f32.mrf.mxu3 }
 0x7b4   :  { %v560_v17 = vrot.slane %v556_v29, 2  ;;  %v606_v10 = vadd.f32 %v1412_v39, %v605_v30 }
 0x7b6   :  { %v562_v19 = vadd.f32 %v560_v17, %v1333_v11  ;;  %v633_v16 = vadd.f32 %v630_v32, %v606_v10 }
 0x7b8   :  { %v563_v21 = vmul.f32 %v562_v19, %v1341_v14  ;;  %v634_v18 = vmul.f32 %v633_v16, %v1341_v14 }
 0x7ba   :  { %1051 = vtanh.f32 %v563_v21 }
 0x7bb   :  { %1053 = vtanh.f32 %v634_v18  ;;  %v698_v20 = vpop.f32.mrf.mxu2 }
 0x7bc   :  { %v701_v34 = vadd.f32 %v698_v20, %v674_v22 }
 0x7be   :  { %v702_v31 = vmul.f32 %v701_v34, %v1341_v14 }
 0x7c0   :  { %v1052_v35 = vpop.eup %1051  ;;  %1055 = vtanh.f32 %v702_v31 }
 0x7c1   :  { %v1054_v36 = vpop.eup %1053  ;;  %v565_v37 = vmul.f32 0.5, %v1052_v35 }
 0x7c2   :  { %v636_v38 = vmul.f32 0.5, %v1054_v36 }
 0x7c3   :  { %v566_v11 = vadd.f32 0.5, %v565_v37 }
 0x7c4   :  { %v637_v40 = vadd.f32 0.5, %v636_v38 }
 0x7c5   :  { %v567_v41 = vsel %vm1335_vm4, %v1052_v35, %v566_v11 }
 0x7c6   :  { %v1056_v42 = vpop.eup %1055  ;;  %573 = vrot.lane.b32.xlu0 %v567_v41, %s1210_s0  ;;  %v638_v43 = vsel %vm1335_vm4, %v1054_v36, %v637_v40  ;;  %v571_v58 = vmul.f32 %v569_v57, %v567_v41 }
 0x7c7   :  { %641 = vrot.lane.b32.xlu1 %v638_v43, %s1210_s0  ;;  %v704_v44 = vmul.f32 0.5, %v1056_v42  ;;  %v639_v61 = vmul.f32 %v638_v43, %v1514_v60 }
 0x7c9   :  { %v705_v45 = vadd.f32 0.5, %v704_v44 }
 0x7cb   :  { %v706_v46 = vsel %vm1335_vm4, %v1056_v42, %v705_v45 }
 0x7cc   :  { %709 = vrot.lane.b32.xlu2 %v706_v46, %s1210_s0  ;;  %v707_v53 = vmul.f32 %v706_v46, %v1522_v7 }
 0x826   :  { %v710_v47 = vpop.permute.xlu2 %709 }
 0x827   :  { %v712_v48 = vmul.f32 %v710_v47, %v706_v46 }
 0x829   :  { %714 = vrot.lane.b32.xlu2 %v712_v48, %s1211_s2 }
 0x838   :  { %v574_v49 = vpop.permute.xlu0 %573 }
 0x839   :  { %v576_v50 = vmul.f32 %v574_v49, %v567_v41  ;;  %v642_v51 = vpop.permute.xlu1 %641 }
 0x83a   :  { %v644_v52 = vmul.f32 %v642_v51, %v638_v43 }
 0x83b   :  { %578 = vrot.lane.b32.xlu0 %v576_v50, %s1211_s2 }
 0x83c   :  { %646 = vrot.lane.b32.xlu1 %v644_v52, %s1211_s2 }
 0x883   :  { %v715_v54 = vpop.permute.xlu2 %714 }
 0x884   :  { %v1569_v55 = vadd.f32 %v715_v54, %v707_v53 }
 0x886   :  { %1057 = vtanh.f32 %v1569_v55 }
 0x88c   :  { %v1058_v56 = vpop.eup %1057 }
 0x88d   :  { %720 = vrot.lane.b32.xlu2 %v1058_v56, %s1210_s0 }
 0x8ad   :  { %v579_v59 = vpop.permute.xlu0 %578 }
 0x8ae   :  { %v581_v62 = vadd.f32 %v579_v59, %v571_v58  ;;  %v647_v63 = vpop.permute.xlu1 %646 }
 0x8af   :  { %v649_v1 = vadd.f32 %v647_v63, %v639_v61 }
 0x8b0   :  { %1059 = vtanh.f32 %v581_v62 }
 0x8b1   :  { %1061 = vtanh.f32 %v649_v1 }
 0x8b6   :  { %v1060_v3 = vpop.eup %1059 }
 0x8b7   :  { %v1062_v5 = vpop.eup %1061  ;;  %584 = vrot.lane.b32.xlu0 %v1060_v3, %s1210_s0 }
 0x8b8   :  { %652 = vrot.lane.b32.xlu1 %v1062_v5, %s1210_s0 }
 0x8e7   :  { %v721_v7 = vpop.permute.xlu2 %720 }
 0x8e8   :  { %v1577_v4 = vmul.f32 %v721_v7, %v706_v46 }
 0x8ea   :  { %819 = vrot.lane.b32.xlu2 %v1577_v4, %s1211_s2  ;;  %v939_v46 = vrot.slane %v1577_v4, 6 }
 0x8ec   :  { %v947_v50 = vsel %vm946_vm6, %v1529_v6, %v939_v46 }
 0x929   :  { %v585_v2 = vpop.permute.xlu0 %584 }
 0x92a   :  { %v587_v8 = vmul.f32 %v585_v2, %v567_v41  ;;  %v653_v60 = vpop.permute.xlu1 %652 }
 0x92b   :  { %v655_v9 = vmul.f32 %v653_v60, %v638_v43  ;;  %v951_v60 = vld [vmem:[%s1644_s10] sm:$0xff] }
 0x92c   :  { %v725_v0 = vrot.slane %v587_v8, 6  ;;  %v952_v8 = vld [vmem:[%s1644_s10 + $0x8] sm:$0xff] }
 0x92d   :  { %751 = vrot.lane.b32.xlu1 %v655_v9, %s1211_s2 }
 0x92e   :  { %726 = vrot.lane.b32.xlu0 %v725_v0, %s1211_s2 }
 0x944   :  { %v820_v13 = vpop.permute.xlu2 %819 }
 0x945   :  { %1008 = vmatmul.msk.f32.vlgmr.msra.gmra.mxu2 %vm177_vm5, %v820_v13 }
 0x99f   :  { %v752_v15 = vpop.permute.xlu1 %751 }
 0x9a0   :  { %1006 = vmatmul.msk.f32.vlgmr.msra.gmra.mxu0 %vm177_vm5, %v752_v15  ;;  %1007 = vmatmul.msk.f32.vlgmr.msra.gmra.mxu1 %vm177_vm5, %v752_v15  ;;  %v727_v23 = vpop.permute.xlu0 %726 }
 0x9a1   :  { %1005 = vmatmul.msk.f32.vlgmr.msrb.gmra.mxu3 %vm177_vm5, %v727_v23 }
 0x9c8   :  { %v840_v26 = vpop.f32.mrf.mxu2 }
 0xa1d   :  { %v815_v24 = vpop.f32.mrf.mxu1  ;;  %v772_v10 = vpop.f32.mrf.mxu0 }
 0xa1e   :  { %v816_v25 = vadd.f32 %v1494_v27, %v815_v24  ;;  %v1026_v24 = vld [vmem:[#allocation9] ss:$0 sm:$0xff] }
 0xa20   :  { %v843_v28 = vadd.f32 %v840_v26, %v816_v25 }
 0xa22   :  { %v844_v29 = vmul.f32 %v843_v28, %v1341_v14 }
 0xa24   :  { %1063 = vtanh.f32 %v844_v29  ;;  %v747_v30 = vpop.f32.mrf.mxu3 }
 0xa25   :  { %v748_v17 = vadd.f32 %v1412_v39, %v747_v30 }
 0xa27   :  { %v775_v32 = vadd.f32 %v772_v10, %v748_v17 }
 0xa29   :  { %v776_v19 = vmul.f32 %v775_v32, %v1341_v14 }
 0xa2a   :  { %v1064_v16 = vpop.eup %1063 }
 0xa2b   :  { %1065 = vtanh.f32 %v776_v19  ;;  %v846_v33 = vmul.f32 0.5, %v1064_v16 }
 0xa2d   :  { %v847_v21 = vadd.f32 0.5, %v846_v33 }
 0xa2f   :  { %v848_v18 = vsel %vm1335_vm4, %v1064_v16, %v847_v21 }
 0xa30   :  { %851 = vrot.lane.b32.xlu1 %v848_v18, %s1210_s0  ;;  %v849_v42 = vmul.f32 %v848_v18, %v1569_v55 }
 0xa31   :  { %v1066_v22 = vpop.eup %1065 }
 0xa32   :  { %v778_v20 = vmul.f32 0.5, %v1066_v22 }
 0xa34   :  { %v779_v34 = vadd.f32 0.5, %v778_v20 }
 0xa36   :  { %v780_v31 = vsel %vm1335_vm4, %v1066_v22, %v779_v34 }
 0xa37   :  { %783 = vrot.lane.b32.xlu0 %v780_v31, %s1210_s0  ;;  %v781_v38 = vmul.f32 %v780_v31, %v649_v1 }
 0xaa2   :  { %v852_v39 = vpop.permute.xlu1 %851 }
 0xaa3   :  { %v854_v35 = vmul.f32 %v852_v39, %v848_v18 }
 0xaa5   :  { %856 = vrot.lane.b32.xlu0 %v854_v35, %s1211_s2 }
 0xaa9   :  { %v784_v36 = vpop.permute.xlu0 %783 }
 0xaaa   :  { %v786_v37 = vmul.f32 %v784_v36, %v780_v31 }
 0xaac   :  { %788 = vrot.lane.b32.xlu2 %v786_v37, %s1211_s2 }
 0xb06   :  { %v789_v11 = vpop.permute.xlu2 %788 }
 0xb07   :  { %v791_v40 = vadd.f32 %v789_v11, %v781_v38 }
 0xb09   :  { %1067 = vtanh.f32 %v791_v40 }
 0xb0f   :  { %v1068_v41 = vpop.eup %1067 }
 0xb10   :  { %794 = vrot.lane.b32.xlu1 %v1068_v41, %s1210_s0 }
 0xb17   :  { %v857_v43 = vpop.permute.xlu0 %856 }
 0xb18   :  { %v859_v44 = vadd.f32 %v857_v43, %v849_v42 }
 0xb1a   :  { %1069 = vtanh.f32 %v859_v44 }
 0xb20   :  { %v1070_v45 = vpop.eup %1069 }
 0xb21   :  { %862 = vrot.lane.b32.xlu2 %v1070_v45, %s1210_s0 }
 0xb7b   :  { %v863_v47 = vpop.permute.xlu2 %862 }
 0xb7c   :  { %v865_v48 = vmul.f32 %v863_v47, %v848_v18 }
 0xb7e   :  { %v941_v49 = vrot.slane %v865_v48, 4  ;;  %892 = vrot.lane.b32.xlu1 %v865_v48, %s1211_s2 }
 0xb80   :  { %v948_v51 = vsel %vm131_vm0, %v947_v50, %v941_v49 }
 0xb82   :  { %v795_v52 = vpop.permute.xlu1 %794 }
 0xb83   :  { %v797_v53 = vmul.f32 %v795_v52, %v780_v31 }
 0xb85   :  { %867 = vrot.lane.b32.xlu0 %v797_v53, %s1211_s2 }
 0xbf0   :  { %v893_v54 = vpop.permute.xlu1 %892 }
 0xbf1   :  { %1010 = vmatmul.msk.f32.vlgmr.msrb.gmra.mxu0 %vm177_vm5, %v893_v54 }
 0xbf7   :  { %v868_v55 = vpop.permute.xlu0 %867 }
 0xbf8   :  { %1009 = vmatmul.msk.f32.vlgmr.msra.gmra.mxu3 %vm177_vm5, %v868_v55 }
 0xc6e   :  { %v913_v58 = vpop.f32.mrf.mxu0 }
 0xc7b   :  { %v888_v56 = vpop.f32.mrf.mxu3 }
 0xc7c   :  { %v889_v57 = vadd.f32 %v1494_v27, %v888_v56 }
 0xc7e   :  { %v916_v59 = vadd.f32 %v913_v58, %v889_v57 }
 0xc80   :  { %v917_v61 = vmul.f32 %v916_v59, %v1341_v14  ;;  %v954_v14 = vld [vmem:[%s1644_s10 + $0x18] sm:$0xff] }
 0xc81   :  { %976 = vmatpush.msrb.mxu1 %v954_v14 }
 0xc82   :  { %1071 = vtanh.f32 %v917_v61 }
 0xc83   :  { %977 = vmatpush.msrb.mxu1 %v953_v12 }
 0xc85   :  { %978 = vmatpush.msrb.mxu1 %v952_v8 }
 0xc87   :  { %979 = vmatpush.msrb.mxu1 %v951_v60 }
 0xc88   :  { %v1072_v6 = vpop.eup %1071 }
 0xc89   :  { %v919_v62 = vmul.f32 0.5, %v1072_v6 }
 0xc8b   :  { %v920_v63 = vadd.f32 0.5, %v919_v62 }
 0xc8d   :  { %v921_v1 = vsel %vm1335_vm4, %v1072_v6, %v920_v63 }
 0xc8e   :  { %924 = vrot.lane.b32.xlu2 %v921_v1, %s1210_s0  ;;  %v922_v7 = vmul.f32 %v921_v1, %v859_v44 }
 0xce8   :  { %v925_v3 = vpop.permute.xlu2 %924 }
 0xce9   :  { %v927_v5 = vmul.f32 %v925_v3, %v921_v1 }
 0xceb   :  { %929 = vrot.lane.b32.xlu0 %v927_v5, %s1211_s2 }
 0xd5d   :  { %v930_v4 = vpop.permute.xlu0 %929 }
 0xd5e   :  { %v932_v27 = vadd.f32 %v930_v4, %v922_v7 }
 0xd60   :  { %1073 = vtanh.f32 %v932_v27 }
 0xd66   :  { %v1074_v2 = vpop.eup %1073 }
 0xd67   :  { %935 = vrot.lane.b32.xlu1 %v1074_v2, %s1210_s0 }
 0xdd9   :  { %v936_v9 = vpop.permute.xlu1 %935 }
 0xdda   :  { %v938_v0 = vmul.f32 %v936_v9, %v921_v1 }
 0xddc   :  { %v944_v13 = vrot.slane %v938_v0, 2 }
 0xdde   :  { %v950_v15 = vsel %vm949_vm7, %v948_v51, %v944_v13 }
 0xddf   :  { %960 = vrot.lane.b32.xlu2 %v950_v15, %s1211_s2 }
 0xe39   :  { %v961_v23 = vpop.permute.xlu2 %960 }
 0xe3a   :  { %1011 = vmatmul.msk.f32.vlgmr.msrb.gmra.mxu1 %vm177_vm5, %v961_v23 }
 0xeb7   :  { %v981_v25 = vpop.f32.mrf.mxu1 }
 0xeb8   :  { %v982_v26 = vadd.f32 %v1026_v24, %v981_v25 }
 0xeba   :  { %984 = vst.msk [vmem:[%s1646_s12] sm:$0xff] %vm127_vm1, %v982_v26 }
 0xebb   :  { %989 = vsyncpa [#allocation3], 1 }
 0xebc   :  { %990 = vsyncpa [#allocation5], 1 }
 0xebd   :  { %991 = vsyncpa [#allocation8], 1 }

</bundles_post_ra>
